<compile_context>
chip_gen: v5e
topology: v5e:2x2
jax: 0.10.0
libtpu: 0.0.40
codegen_flags: <defaults>
</compile_context>

<pallas_src>
import functools

import jax
import jax.numpy as jnp
from jax.experimental import pallas as pl
from jax.experimental.pallas import tpu as pltpu


# ----------------------------------------------------------------------------
# Generation-gated tiling / VMEM budget.
# ----------------------------------------------------------------------------
def _vmem_capacity_bytes():
    try:
        info = pltpu.get_tpu_info()
        for attr in ("vmem_capacity_bytes", "vmem_size_bytes", "vmem_bytes"):
            v = getattr(info, attr, None)
            if v:
                return int(v)
    except Exception:
        pass
    return 64 * 1024 * 1024  # conservative (v7x-sized) fallback


_VMEM_CAP = _vmem_capacity_bytes()
if _VMEM_CAP >= 96 * 1024 * 1024:          # v5e / v6e: 128 MiB physical VMEM
    _MM_TM_CAP, _MM_TN_CAP, _MM_TK_CAP = 512, 512, 1024
    _VMEM_LIMIT = 64 * 1024 * 1024
else:                                      # v7x: 64 MiB physical VMEM, 3.2 TB/s HBM
    _MM_TM_CAP, _MM_TN_CAP, _MM_TK_CAP = 256, 256, 512
    _VMEM_LIMIT = 32 * 1024 * 1024


def _fit(dim, cap, align):
    """Largest tile <= cap that divides `dim` and is a multiple of `align`.
    Returns `dim` itself when dim <= cap or no aligned divisor exists (a
    full-dimension block is always legal under the (8,128) rule)."""
    if dim <= cap:
        return dim
    t = (cap // align) * align
    while t >= align:
        if dim % t == 0:
            return t
        t -= align
    # TODO(synk): masked last block via pl.cdiv grid for dims with no aligned divisor.
    return dim


# ----------------------------------------------------------------------------
# Tiled linear kernels: y = x @ W (+ b), bf16 operands, f32 VMEM accumulator.
# ----------------------------------------------------------------------------
def _matmul_kernel(x_ref, w_ref, o_ref, acc_ref):
    @pl.when(pl.program_id(2) == 0)
    def _():
        acc_ref[...] = jnp.zeros_like(acc_ref)

    acc_ref[...] += jnp.dot(x_ref[...], w_ref[...],
                            preferred_element_type=jnp.float32)

    @pl.when(pl.program_id(2) == pl.num_programs(2) - 1)
    def _():
        o_ref[...] = acc_ref[...].astype(o_ref.dtype)


def _matmul_bias_kernel(x_ref, w_ref, b_ref, o_ref, acc_ref):
    @pl.when(pl.program_id(2) == 0)
    def _():
        acc_ref[...] = jnp.zeros_like(acc_ref)

    acc_ref[...] += jnp.dot(x_ref[...], w_ref[...],
                            preferred_element_type=jnp.float32)

    @pl.when(pl.program_id(2) == pl.num_programs(2) - 1)
    def _():
        o_ref[...] = (acc_ref[...] + b_ref[...]).astype(o_ref.dtype)


def linear(x2d, w, b=None, *, out_dtype=jnp.bfloat16):
    """x2d: (M, K) bf16, w: (K, N) bf16 (callers cast once, not per call),
    optional b: (N,) -> (M, N) out_dtype.  f32 accumulation on the MXU."""
    M, K = x2d.shape
    N = w.shape[1]
    tm = _fit(M, _MM_TM_CAP, 8)
    tn = _fit(N, _MM_TN_CAP, 128)
    tk = _fit(K, _MM_TK_CAP, 128)

    x_spec = pl.BlockSpec((tm, tk), lambda i, j, k: (i, k))
    w_spec = pl.BlockSpec((tk, tn), lambda i, j, k: (k, j))
    o_spec = pl.BlockSpec((tm, tn), lambda i, j, k: (i, j))
    grid = (M // tm, N // tn, K // tk)
    scratch = [pltpu.VMEM((tm, tn), jnp.float32)]
    cparams = pltpu.CompilerParams(
        dimension_semantics=("parallel", "parallel", "arbitrary"),
        vmem_limit_bytes=_VMEM_LIMIT,
    )

    if b is None:
        return pl.pallas_call(
            _matmul_kernel,
            out_shape=jax.ShapeDtypeStruct((M, N), out_dtype),
            grid=grid,
            in_specs=[x_spec, w_spec],
            out_specs=o_spec,
            scratch_shapes=scratch,
            compiler_params=cparams,
        )(x2d, w)

    b2d = b.reshape(1, N).astype(jnp.float32)
    b_spec = pl.BlockSpec((1, tn), lambda i, j, k: (0, j))
    return pl.pallas_call(
        _matmul_bias_kernel,
        out_shape=jax.ShapeDtypeStruct((M, N), out_dtype),
        grid=grid,
        in_specs=[x_spec, w_spec, b_spec],
        out_specs=o_spec,
        scratch_shapes=scratch,
        compiler_params=cparams,
    )(x2d, w, b2d)


# ----------------------------------------------------------------------------
# Flash-style attention kernel: grid = (batch, query-tile, kv-tile).
# Per-head LayerNorm (emb**-0.25 folded into gamma/beta), masked softmax in the
# AllenNLP sense (softmax(dot*mask)*mask renormalized) computed online over kv
# tiles, head merge done in-kernel -> one lane-dense (tq, emb) store.
# ----------------------------------------------------------------------------
def _attention_kernel(q_ref, kv_ref, mq_ref, mk_ref, qg_ref, qb_ref, kg_ref, kb_ref,
                      o_ref, qn_scr, m_scr, l_scr, acc_scr, *, heads, eps):
    H = heads
    tq = q_ref.shape[1]
    emb = q_ref.shape[2]
    hs = emb // H
    kv_step = pl.program_id(2)

    def layernorm(t, g, b):            # t: (T, hs) f32; biased variance like torch
        mu = jnp.mean(t, axis=-1, keepdims=True)
        var = jnp.mean(jnp.square(t - mu), axis=-1, keepdims=True)
        return (t - mu) * jax.lax.rsqrt(var + eps) * g + b

    @pl.when(kv_step == 0)
    def _():
        m_scr[...] = jnp.full(m_scr.shape, -jnp.inf, m_scr.dtype)
        l_scr[...] = jnp.zeros(l_scr.shape, l_scr.dtype)
        acc_scr[...] = jnp.zeros(acc_scr.shape, acc_scr.dtype)
        q = q_ref[0].astype(jnp.float32)                         # (tq, emb)
        qg = qg_ref[...]
        qb = qb_ref[...]
        for h in range(H):                                       # in-kernel head split
            qh = q[:, h * hs:(h + 1) * hs]                       # (tq, hs)
            qn_scr[h] = layernorm(qh, qg, qb).astype(jnp.bfloat16)

    kv = kv_ref[0]                                               # (tk, 2*emb) bf16
    mq = mq_ref[0].astype(jnp.float32)                           # (tq, 1)
    mk = mk_ref[0].astype(jnp.float32)                           # (1, tk)
    mask = mq * mk                                               # (tq, tk), built in-kernel
    kg = kg_ref[...]
    kb = kb_ref[...]

    for h in range(H):
        kh = kv[:, h * hs:(h + 1) * hs].astype(jnp.float32)      # (tk, hs)
        vh = kv[:, emb + h * hs: emb + (h + 1) * hs]             # (tk, hs) bf16
        knh = layernorm(kh, kg, kb).astype(jnp.bfloat16)
        # q @ k^T without materializing a transpose (contract the hs axis of both).
        s = jax.lax.dot_general(qn_scr[h], knh, (((1,), (1,)), ((), ())),
                                preferred_element_type=jnp.float32)   # (tq, tk)
        s = s * mask                                             # masked_softmax: softmax(dot*mask)

        m_prev = m_scr[h]                                        # (tq, 1)
        m_new = jnp.maximum(m_prev, jnp.max(s, axis=-1, keepdims=True))
        alpha = jnp.exp(m_prev - m_new)
        e = jnp.exp(s - m_new) * mask                            # only unmasked entries count
        l_scr[h] = alpha * l_scr[h] + jnp.sum(e, axis=-1, keepdims=True)
        acc_scr[h] = alpha * acc_scr[h] + jnp.dot(
            e.astype(jnp.bfloat16), vh, preferred_element_type=jnp.float32)
        m_scr[h] = m_new

    @pl.when(kv_step == pl.num_programs(2) - 1)
    def _():
        outs = []
        for h in range(H):
            inv = pl.reciprocal(l_scr[h] + 1e-13, approx=True)   # single EUP reciprocal
            outs.append(acc_scr[h] * inv)                        # (tq, hs)
        # In-kernel head merge -> one lane-dense (tq, emb) store.
        o_ref[0] = jnp.concatenate(outs, axis=-1).astype(o_ref.dtype)


def attention(q3, kv3, mask_q, mask_k, qg, qb, kg, kb, *, heads):
    """q3: (B, itok, emb) bf16, kv3: (B, tok, 2*emb) bf16 (k|v fused on lanes),
    mask_q: (B, itok, 1) f32, mask_k: (B, 1, tok) f32 -> (B, itok, emb) bf16."""
    B, itok, emb = q3.shape
    tok = kv3.shape[1]
    hs = emb // heads

    tq = _fit(itok, 256, 8)      # sublane-aligned query tile
    tk = _fit(tok, 512, 128)     # kv tile is a lane dim in the key-mask block
    grid = (B, itok // tq, tok // tk)

    kernel = functools.partial(_attention_kernel, heads=heads, eps=1e-5)
    gb_spec = pl.BlockSpec((1, hs), lambda b, qi, ki: (0, 0))
    return pl.pallas_call(
        kernel,
        out_shape=jax.ShapeDtypeStruct((B, itok, emb), jnp.bfloat16),
        grid=grid,
        in_specs=[
            pl.BlockSpec((1, tq, emb), lambda b, qi, ki: (b, qi, 0)),
            pl.BlockSpec((1, tk, 2 * emb), lambda b, qi, ki: (b, ki, 0)),
            pl.BlockSpec((1, tq, 1), lambda b, qi, ki: (b, qi, 0)),
            pl.BlockSpec((1, 1, tk), lambda b, qi, ki: (b, 0, ki)),
            gb_spec, gb_spec, gb_spec, gb_spec,
        ],
        out_specs=pl.BlockSpec((1, tq, emb), lambda b, qi, ki: (b, qi, 0)),
        scratch_shapes=[
            pltpu.VMEM((heads, tq, hs), jnp.bfloat16),   # LN(q), computed once per (b, qi)
            pltpu.VMEM((heads, tq, 1), jnp.float32),     # running max
            pltpu.VMEM((heads, tq, 1), jnp.float32),     # running sum of e*mask
            pltpu.VMEM((heads, tq, hs), jnp.float32),    # running weighted-value acc
        ],
        compiler_params=pltpu.CompilerParams(
            dimension_semantics=("parallel", "parallel", "arbitrary"),
            vmem_limit_bytes=_VMEM_LIMIT,
        ),
    )(q3, kv3, mask_q, mask_k, qg, qb, kg, kb)


# ----------------------------------------------------------------------------
# Full forward pass (matches ContextualAttention.forward semantics, kqnorm=True).
# ----------------------------------------------------------------------------
def contextual_attention_forward(params, x, context, mask=None, context_mask=None):
    batch, itok, emb = x.shape
    cbatch, ctok, cemb = context.shape
    assert cbatch == batch and cemb == emb
    heads = params["heads"]
    hs = emb // heads
    tok = itok + ctok

    if mask is None:
        mask = jnp.ones((batch, itok), dtype=jnp.float32)
    if context_mask is None:
        context_mask = jnp.ones((batch, ctok), dtype=jnp.float32)

    # bf16 activations end-to-end: one upfront cast, nothing per-pallas_call.
    x_bf = x.astype(jnp.bfloat16)
    c_bf = context.astype(jnp.bfloat16)
    x_plus_context = jnp.concatenate([x_bf, c_bf], axis=1)        # (B, tok, emb) bf16
    # TODO(synk): stream x and context as two inputs to the kv matmul (scalar-prefetched
    # ragged token offsets) instead of materializing this concat at production shapes.

    # Weights cast once per call; in production they would already be stored bf16.
    wq = params["wq"].astype(jnp.bfloat16)
    w_kv = jnp.concatenate([params["wk"], params["wv"]], axis=1).astype(jnp.bfloat16)
    wu = params["wu"].astype(jnp.bfloat16)

    # q from x; fused k|v projection over x_plus_context (one HBM pass, one launch).
    q = linear(x_bf.reshape(batch * itok, emb), wq)                      # (B*itok, emb) bf16
    kv = linear(x_plus_context.reshape(batch * tok, emb), w_kv)          # (B*tok, 2*emb) bf16

    q3 = q.reshape(batch, itok, emb)
    kv3 = kv.reshape(batch, tok, 2 * emb)

    # Masks stay factored; the (B, itok, tok) outer product is built inside the kernel.
    mask_q = mask.astype(jnp.float32).reshape(batch, itok, 1)
    mask_k = jnp.concatenate([mask, context_mask], axis=1)
    mask_k = mask_k.astype(jnp.float32).reshape(batch, 1, tok)

    # Fold the 1/emb**0.25 scaling of q and k into the LayerNorm affine params
    # (exact rewrite: (LN(x)*g + b)/s == LN(x)*(g/s) + (b/s)).
    scale = emb ** 0.25
    qg = (params["q_gamma"] / scale).reshape(1, hs)
    qb = (params["q_beta"] / scale).reshape(1, hs)
    kg = (params["k_gamma"] / scale).reshape(1, hs)
    kb = (params["k_beta"] / scale).reshape(1, hs)

    attn = attention(q3, kv3, mask_q, mask_k, qg, qb, kg, kb, heads=heads)  # (B,itok,emb) bf16

    y = linear(attn.reshape(batch * itok, emb), wu, params["bu"],
               out_dtype=jnp.float32)
    return y.reshape(batch, itok, emb)


def init_params(key, emb, heads):
    """Deterministic synthetic parameters. Linear weights stored already
    transposed (in, out) so kernels compute x @ W (+ b)."""
    hs = emb // heads
    ks = jax.random.split(key, 5)
    bound = 1.0 / (emb ** 0.5)
    u = lambda k, shape: jax.random.uniform(k, shape, jnp.float32, -bound, bound)
    return {
        "heads": heads,
        "wq": u(ks[0], (emb, emb)),
        "wk": u(ks[1], (emb, emb)),
        "wv": u(ks[2], (emb, emb)),
        "wu": u(ks[3], (emb, emb)),
        "bu": u(ks[4], (emb,)),
        # LayerNorm([headsize]) defaults: gamma=1, beta=0
        "q_gamma": jnp.ones((hs,), jnp.float32),
        "q_beta": jnp.zeros((hs,), jnp.float32),
        "k_gamma": jnp.ones((hs,), jnp.float32),
        "k_beta": jnp.zeros((hs,), jnp.float32),
    }


if __name__ == "__main__":
    key = jax.random.PRNGKey(0)
    kx, kc, kp = jax.random.split(key, 3)

    batch, itok, ctok, emb, heads = 2, 8, 8, 32, 8
    x = jax.random.normal(kx, (batch, itok, emb), jnp.float32)
    context = jax.random.normal(kc, (batch, ctok, emb), jnp.float32)
    params = init_params(kp, emb, heads)

    y = contextual_attention_forward(params, x, context)
    jax.block_until_ready(y)
    assert y.shape == (batch, itok, emb)
    assert bool(jnp.all(jnp.isfinite(y)))
    print("KERNEL_OK")
</pallas_src>

<mosaic_0001>
module attributes {stable_mosaic.version = 11 : i64} {
  func.func @_matmul_kernel(%arg0: i32, %arg1: i32, %arg2: i32, %arg3: memref<16x32xbf16, #tpu.memory_space<vmem>>, %arg4: memref<32x32xbf16, #tpu.memory_space<vmem>>, %arg5: memref<16x32xbf16, #tpu.memory_space<vmem>>, %arg6: memref<16x32xf32, #tpu.memory_space<vmem>>) attributes {dimension_semantics = [#tpu.dimension_semantics<parallel>, #tpu.dimension_semantics<parallel>, #tpu.dimension_semantics<arbitrary>], iteration_bounds = array<i64: 1, 1, 1>, scalar_prefetch = 0 : i64, scratch_operands = 1 : i64, tpu.core_type = #tpu.core_type<tc>, window_params = [{transform_indices = @transform_0, window_bounds = array<i64: 16, 32>}, {transform_indices = @transform_1, window_bounds = array<i64: 32, 32>}, {transform_indices = @transform_2, window_bounds = array<i64: 16, 32>}]} {
    %c0_i32 = arith.constant 0 : i32
    %0 = arith.cmpi eq, %arg2, %c0_i32 : i32
    %1 = arith.extui %0 : i1 to i32
    %c0_i32_0 = arith.constant 0 : i32
    %2 = arith.cmpi ne, %1, %c0_i32_0 : i32
    scf.if %2 {
      %cst_10 = arith.constant 0.000000e+00 : f32
      %12 = vector.broadcast %cst_10 : f32 to vector<16x32xf32>
      %c0_11 = arith.constant 0 : index
      %c0_12 = arith.constant 0 : index
      %13 = vector.load %arg6[%c0_11, %c0_12] : memref<16x32xf32, #tpu.memory_space<vmem>>, vector<16x32xf32>
      tpu.vector_store %arg6[%c0_11, %c0_12], %12 {strides = array<i32>} : memref<16x32xf32, #tpu.memory_space<vmem>>, vector<16x32xf32>,
    } else {
    }
    %c0 = arith.constant 0 : index
    %c0_1 = arith.constant 0 : index
    %3 = vector.load %arg6[%c0, %c0_1] : memref<16x32xf32, #tpu.memory_space<vmem>>, vector<16x32xf32>
    %c0_2 = arith.constant 0 : index
    %c0_3 = arith.constant 0 : index
    %4 = vector.load %arg3[%c0_2, %c0_3] : memref<16x32xbf16, #tpu.memory_space<vmem>>, vector<16x32xbf16>
    %c0_4 = arith.constant 0 : index
    %c0_5 = arith.constant 0 : index
    %5 = vector.load %arg4[%c0_4, %c0_5] : memref<32x32xbf16, #tpu.memory_space<vmem>>, vector<32x32xbf16>
    %cst = arith.constant dense<0.000000e+00> : vector<16x32xf32>
    %6 = tpu.matmul %4, %5, %cst {dimension_numbers = #tpu.dot_dimension_numbers<[1], [0], [0], [1], [0, 0, 1, 1], [], []>} : vector<16x32xbf16>, vector<32x32xbf16>, vector<16x32xf32> -> vector<16x32xf32>
    %7 = arith.addf %3, %6 : vector<16x32xf32>
    %c0_6 = arith.constant 0 : index
    %c0_7 = arith.constant 0 : index
    %8 = vector.load %arg6[%c0_6, %c0_7] : memref<16x32xf32, #tpu.memory_space<vmem>>, vector<16x32xf32>
    tpu.vector_store %arg6[%c0_6, %c0_7], %7 {strides = array<i32>} : memref<16x32xf32, #tpu.memory_space<vmem>>, vector<16x32xf32>,
    %c0_i32_8 = arith.constant 0 : i32
    %9 = arith.cmpi eq, %arg2, %c0_i32_8 : i32
    %10 = arith.extui %9 : i1 to i32
    %c0_i32_9 = arith.constant 0 : i32
    %11 = arith.cmpi ne, %10, %c0_i32_9 : i32
    scf.if %11 {
      %c0_10 = arith.constant 0 : index
      %c0_11 = arith.constant 0 : index
      %12 = vector.load %arg6[%c0_10, %c0_11] : memref<16x32xf32, #tpu.memory_space<vmem>>, vector<16x32xf32>
      %13 = arith.truncf %12 : vector<16x32xf32> to vector<16x32xbf16>
      %c0_12 = arith.constant 0 : index
      %c0_13 = arith.constant 0 : index
      %14 = vector.load %arg5[%c0_12, %c0_13] : memref<16x32xbf16, #tpu.memory_space<vmem>>, vector<16x32xbf16>
      tpu.vector_store %arg5[%c0_12, %c0_13], %13 {strides = array<i32>} : memref<16x32xbf16, #tpu.memory_space<vmem>>, vector<16x32xbf16>,
    } else {
    }
    return
  }
  func.func @transform_0(%arg0: i32, %arg1: i32, %arg2: i32) -> (i32, i32) {
    %c0_i32 = arith.constant 0 : i32
    return %arg0, %arg2 : i32, i32
  }
  func.func @transform_1(%arg0: i32, %arg1: i32, %arg2: i32) -> (i32, i32) {
    %c0_i32 = arith.constant 0 : i32
    return %arg2, %arg1 : i32, i32
  }
  func.func @transform_2(%arg0: i32, %arg1: i32, %arg2: i32) -> (i32, i32) {
    %c0_i32 = arith.constant 0 : i32
    return %arg0, %arg1 : i32, i32
  }
}

</mosaic_0001>

<bundles_post_ra>
// kernel: tpu_custom_call.1
= control target key start
LH: loop header
LB: loop body
LE: loop exit
PB: predicated region body
PF: predicated region fallthrough
CT: control target
= control target key end

     0   :  { %7 = vsyncpa [#allocation4], 0  ;;  %s273_s0 = inlined_call_operand.hbm [shape: bf16[16,32], index: 0, kind: input, shape index: {}]   ;;  %s274_s1 = inlined_call_operand.hbm [shape: bf16[32,32], index: 1, kind: input, shape index: {}]   ;;  %s275_s2 = inlined_call_operand.hbm [shape: bf16[16,32], index: 2, kind: output, shape index: {}]  }
   0x1   :  { %8 = vsyncpa [#allocation7], 0 }
   0x2   :  { %9 = vsyncpa [#allocation5], 0  ;;  %s14_s11 = sshll.u32 %s273_s0, 4  ;;  %s229_s12 = smov [#allocation3]   ;;  %s15_s11 = int_to_ptr.hbm [resolvable:$true] %s14_s11 }
   0x3   :  { %s16_s13 = sshll.u32 %s229_s12, 4  ;;  %s27_s16 = sshll.u32 %s274_s1, 4  ;;  %s17_s13 = int_to_ptr.vmem [resolvable:$true] %s16_s13  ;;  %s28_s16 = int_to_ptr.hbm [resolvable:$true] %s27_s16 }
   0x4   :  { %s230_s17 = smov 64   ;;  %s231_s18 = smov 4  }
   0x5   :  { %22 = dma.hbm_to_vmem [thread:$0]  %s15_s11, 128, %s17_s13, [#allocation4], %s230_s17, %s230_s17, %s231_s18  }
   0x6   :  { %s232_s19 = smov [#allocation6]  }
   0x7   :  { %s29_s20 = sshll.u32 %s232_s19, 4  ;;  %s30_s20 = int_to_ptr.vmem [resolvable:$true] %s29_s20 }
   0x8   :  { %35 = dma.hbm_to_vmem [thread:$0]  %s28_s16, 256, %s30_s20, [#allocation7], %s230_s17, %s230_s17, %s231_s18  }
   0x9   :  { %223 = dma.done.wait [#allocation4], 128  }
   0xa   :  { %224 = vsyncadd [#allocation4], 4294967168 }
   0xb   :  { %225 = dma.done.wait [#allocation7], 256  }
   0xc   :  { %226 = vsyncadd [#allocation7], 4294967040  ;;  %vm49_vm0 = vcmask 261120   ;;  %v233_v0 = vmov 0.0   ;;  %v144_v1 = vld [vmem:[#allocation6 + $0x8] sm:$0xff]  ;;  %v143_v2 = vld [vmem:[#allocation6] sm:$0xff] }
   0xd   :  { %50 = vst.msk [vmem:[#allocation2] sm:$0xff] %vm49_vm0, %v233_v0  ;;  %87 = vmatpush.bf16.msra.mxu0 %v144_v1  ;;  %v142_v3 = vld [vmem:[#allocation3] sm:$0xff]  ;;  %vm106_vm1 = vcmask 257024   ;;  %s234_s0 = smov [#allocation8]   ;;  %s115_s23 = sshll.u32 %s275_s2, 4  ;;  %s116_s23 = int_to_ptr.hbm [resolvable:$true] %s115_s23 }
   0xe   :  { %51 = vst.msk [vmem:[#allocation2 + $0x8] sm:$0xff] %vm49_vm0, %v233_v0  ;;  %s113_s1 = sshll.u32 %s234_s0, 4  ;;  %s114_s1 = int_to_ptr.vmem [resolvable:$true] %s113_s1 }
  0x11   :  { %88 = vmatpush.bf16.msra.mxu0 %v143_v2 }
  0x14   :  { %141 = vmatmul.msk.bf16.vlgmr.msra.gmra.mxu0 %vm49_vm0, %v142_v3  ;;  %v52_v4 = vld [vmem:[#allocation2] sm:$0xff] }
  0x15   :  { %v53_v7 = vld [vmem:[#allocation2 + $0x8] sm:$0xff] }
  0x91   :  { %v90_v5 = vpop.f32.mrf.mxu0 }
  0x92   :  { %v95_v6 = vadd.f32 %v90_v5, %v52_v4 }
  0x94   :  { %97 = vst.msk [vmem:[#allocation2] sm:$0xff] %vm49_vm0, %v95_v6 }
  0x99   :  { %v92_v8 = vpop.f32.mrf.mxu0 }
  0x9a   :  { %v96_v9 = vadd.f32 %v92_v8, %v53_v7 }
  0x9b   :  { %v102_v10 = vld [vmem:[#allocation2] sm:$0xff] }
  0x9c   :  { %98 = vst.msk [vmem:[#allocation2 + $0x8] sm:$0xff] %vm49_vm0, %v96_v9  ;;  %v104_v11 = vpack.c.bf16 %v102_v10, %v102_v10 }
  0x9e   :  { %107 = vst.msk [vmem:[#allocation8] sm:$0xf] %vm106_vm1, %v104_v11 }
  0xa3   :  { %v103_v12 = vld [vmem:[#allocation2 + $0x8] sm:$0xff] }
  0xa4   :  { %v105_v13 = vpack.c.bf16 %v103_v12, %v103_v12 }
  0xa6   :  { %108 = vst.msk [vmem:[#allocation8 + $0x4] sm:$0xf] %vm106_vm1, %v105_v13 }
  0xa7   :  { %121 = dma.vmem_to_hbm [thread:$0]  %s114_s1, 128, %s116_s23, [#allocation5], %s230_s17, %s230_s17, %s231_s18  }
  0xa8   :  { %227 = dma.done.wait [#allocation5], 128  }
  0xa9   :  { %228 = vsyncadd [#allocation5], 4294967168 }
  0xaa   :  { %126 = vsyncpa [#allocation4], 1 }
  0xab   :  { %127 = vsyncpa [#allocation7], 1 }
  0xac   :  { %128 = vsyncpa [#allocation5], 1 }

</bundles_post_ra>
